<compile_context>
chip_gen: v6e
topology: v6e:2x2x1
jax: 0.10.0
libtpu: 0.0.40
codegen_flags: <defaults>
</compile_context>

<pallas_src>
import jax
import jax.numpy as jnp
from jax import lax
from jax.experimental import pallas as pl
from jax.experimental.pallas import tpu as pltpu


def _pooler_kernel(x_ref, w_ref, b_ref, o_ref):
    # x_ref: (Bp, H_in)   resident across the grid (same block every step)
    # w_ref: (TN, H_in)   torch-Linear layout tile (rows = output features), streamed
    # b_ref: (1, TN)
    # o_ref: (Bp, TN)
    y = lax.dot_general(
        x_ref[...], w_ref[...],
        dimension_numbers=(((1,), (1,)), ((), ())),   # x @ W.T on the MXU, no transpose copy
        preferred_element_type=jnp.float32)
    y = y + b_ref[...].astype(jnp.float32)
    o_ref[...] = jnp.tanh(y).astype(o_ref.dtype)


def _sublane_multiple(dtype):
    itemsize = jnp.dtype(dtype).itemsize
    return {4: 8, 2: 16, 1: 32}.get(itemsize, 8)


def _pick_tn(h_out, dtype, tn=None):
    """Output-feature tile width: big enough to amortize per-step overhead,
    small enough that 2x (double buffer) x (TN, H_in) is VMEM-safe on v7x."""
    if tn is not None:
        return tn
    cap = 1024 if jnp.dtype(dtype).itemsize == 2 else 512
    if h_out <= cap:
        return h_out
    for cand in range(cap, 0, -128):      # largest multiple of 128 dividing H_out
        if h_out % cand == 0:
            return cand
    return cap


def _dense_tanh_pallas(x, weight, bias, *, tn=None):
    """y = tanh(x @ weight.T + bias), torch.nn.Linear weight layout.

    x: (B, H_in); weight: (H_out, H_in); bias: (H_out,)
    """
    B, H_in = x.shape
    H_out = weight.shape[0]
    dtype = x.dtype

    # Pad batch to a full sublane so loads/stores are unmasked.
    bp = _sublane_multiple(dtype)
    Bp = ((B + bp - 1) // bp) * bp
    if Bp != B:
        x = jnp.pad(x, ((0, Bp - B), (0, 0)))

    TN = _pick_tn(H_out, dtype, tn)
    grid = (pl.cdiv(H_out, TN),)

    b2d = bias.reshape(1, H_out)          # width = H_out (handles H_out != H_in)

    itemsize = jnp.dtype(dtype).itemsize
    cost = pl.CostEstimate(
        flops=2 * Bp * H_in * H_out,
        transcendentals=Bp * H_out,
        bytes_accessed=(H_out * H_in + Bp * H_in + Bp * H_out + H_out) * itemsize,
    )

    out = pl.pallas_call(
        _pooler_kernel,
        out_shape=jax.ShapeDtypeStruct((Bp, H_out), dtype),
        grid_spec=pltpu.PrefetchScalarGridSpec(
            num_scalar_prefetch=0,
            grid=grid,
            in_specs=[
                # activations: same block every grid step -> stays resident in VMEM
                pl.BlockSpec((Bp, H_in), lambda j: (0, 0)),
                # weight rows (output features): streamed + double-buffered over j
                pl.BlockSpec((TN, H_in), lambda j: (j, 0)),
                # bias tile
                pl.BlockSpec((1, TN), lambda j: (0, j)),
            ],
            out_specs=pl.BlockSpec((Bp, TN), lambda j: (0, j)),
        ),
        compiler_params=pltpu.CompilerParams(
            dimension_semantics=("parallel",)),   # independent N tiles -> v7x 2-TC sharding
        cost_estimate=cost,
    )(x, weight, b2d)

    return out[:B] if Bp != B else out


def bert_pooler(hidden_states, input_lengths, remove_input_padding, weight, bias):
    """JAX/Pallas equivalent of BertPooler.forward (torch Linear weight layout)."""
    if not remove_input_padding:
        # select(hidden_states, dim=1, index=0) — cheap strided slice of B*H elems.
        first_token_tensor = hidden_states[:, 0, :]
    else:
        # cumsum(concat([0, input_lengths[:-1]])) -> first-token row offsets.
        # TODO(synk): this tiny (B rows) gather stays as an XLA gather in the wrapper;
        # fusing a data-dependent row gather into the matmul kernel would force a
        # per-row grid that re-streams the weight B times (worse for this HBM-bound op).
        lens = input_lengths.astype(jnp.int32)
        starts = jnp.cumsum(
            jnp.concatenate([jnp.zeros((1,), jnp.int32), lens[:-1]]), axis=0)
        first_token_tensor = jnp.take(hidden_states, starts, axis=0)
    return _dense_tanh_pallas(first_token_tensor, weight, bias)


if __name__ == "__main__":
    # Small shapes: batch=4, seq=8, hidden=256 (tn=128 forces a multi-step grid
    # so the streamed/double-buffered weight path is actually exercised).
    B, S, H = 4, 8, 256
    dtype = jnp.float32

    key = jax.random.PRNGKey(0)
    k_hs, k_w, k_b, k_pk = jax.random.split(key, 4)

    # torch Linear shapes: W [H_out, H_in], b [H_out]
    weight = (jax.random.normal(k_w, (H, H), dtype=jnp.float32) * 0.02).astype(dtype)
    bias = (jax.random.normal(k_b, (H,), dtype=jnp.float32) * 0.02).astype(dtype)

    # ----- padded mode -----
    hidden_states = jax.random.normal(k_hs, (B, S, H), dtype=jnp.float32).astype(dtype)
    input_lengths = jnp.full((B,), S, dtype=jnp.int32)

    out_padded = jax.block_until_ready(
        _dense_tanh_pallas(hidden_states[:, 0, :], weight, bias, tn=128))
    ref = jnp.tanh(hidden_states[:, 0, :] @ weight.T + bias)
    assert out_padded.shape == (B, H)
    assert jnp.allclose(out_padded, ref, atol=1e-5, rtol=1e-5)

    # same path through the public wrapper
    out_padded2 = jax.block_until_ready(
        bert_pooler(hidden_states, input_lengths, False, weight, bias))
    assert jnp.allclose(out_padded2, ref, atol=1e-5, rtol=1e-5)

    # ----- remove_input_padding (packed) mode -----
    lens = jnp.array([3, 5, 2, 6], dtype=jnp.int32)
    total = int(lens.sum())
    packed = jax.random.normal(k_pk, (total, H), dtype=jnp.float32).astype(dtype)

    out_packed = jax.block_until_ready(
        bert_pooler(packed, lens, True, weight, bias))
    starts = jnp.cumsum(jnp.concatenate([jnp.zeros((1,), jnp.int32), lens[:-1]]))
    ref_packed = jnp.tanh(packed[starts, :] @ weight.T + bias)
    assert jnp.allclose(out_packed, ref_packed, atol=1e-5, rtol=1e-5)

    # ----- bf16 path (exercises Bp=16 padding and bf16 tile cap) -----
    hs_bf16 = hidden_states.astype(jnp.bfloat16)
    w_bf16 = weight.astype(jnp.bfloat16)
    b_bf16 = bias.astype(jnp.bfloat16)
    out_bf16 = jax.block_until_ready(
        bert_pooler(hs_bf16, input_lengths, False, w_bf16, b_bf16))
    ref_bf16 = jnp.tanh(hs_bf16[:, 0, :].astype(jnp.float32)
                        @ w_bf16.T.astype(jnp.float32) + b_bf16.astype(jnp.float32))
    assert out_bf16.shape == (B, H)
    assert jnp.allclose(out_bf16.astype(jnp.float32), ref_bf16, atol=2e-2, rtol=2e-2)

    print("KERNEL_OK")
</pallas_src>

<mosaic_0001>
module attributes {stable_mosaic.version = 11 : i64} {
  func.func @_pooler_kernel(%arg0: i32, %arg1: memref<8x256xf32, #tpu.memory_space<vmem>>, %arg2: memref<128x256xf32, #tpu.memory_space<vmem>>, %arg3: memref<1x128xf32, #tpu.memory_space<vmem>>, %arg4: memref<8x128xf32, #tpu.memory_space<vmem>>) attributes {dimension_semantics = [#tpu.dimension_semantics<parallel>], iteration_bounds = array<i64: 2>, scalar_prefetch = 0 : i64, scratch_operands = 0 : i64, tpu.core_type = #tpu.core_type<tc>, window_params = [{pipeline_mode = #tpu.pipeline_mode<synchronous>, transform_indices = @transform_0, window_bounds = array<i64: 8, 256>}, {transform_indices = @transform_1, window_bounds = array<i64: 128, 256>}, {transform_indices = @transform_2, window_bounds = array<i64: 1, 128>}, {transform_indices = @transform_3, window_bounds = array<i64: 8, 128>}]} {
    %c0 = arith.constant 0 : index
    %c0_0 = arith.constant 0 : index
    %0 = vector.load %arg1[%c0, %c0_0] : memref<8x256xf32, #tpu.memory_space<vmem>>, vector<8x256xf32>
    %c0_1 = arith.constant 0 : index
    %c0_2 = arith.constant 0 : index
    %1 = vector.load %arg2[%c0_1, %c0_2] : memref<128x256xf32, #tpu.memory_space<vmem>>, vector<128x256xf32>
    %cst = arith.constant dense<0.000000e+00> : vector<8x128xf32>
    %2 = tpu.matmul %0, %1, %cst {dimension_numbers = #tpu.dot_dimension_numbers<[1], [1], [0], [0], [0, 0, 1, 0], [], []>} : vector<8x256xf32>, vector<128x256xf32>, vector<8x128xf32> -> vector<8x128xf32>
    %c0_3 = arith.constant 0 : index
    %c0_4 = arith.constant 0 : index
    %3 = vector.load %arg3[%c0_3, %c0_4] : memref<1x128xf32, #tpu.memory_space<vmem>>, vector<1x128xf32>
    %4 = vector.broadcast %3 : vector<1x128xf32> to vector<8x128xf32>
    %5 = arith.addf %2, %4 : vector<8x128xf32>
    %6 = math.tanh %5 : vector<8x128xf32>
    %c0_5 = arith.constant 0 : index
    %c0_6 = arith.constant 0 : index
    %7 = vector.load %arg4[%c0_5, %c0_6] : memref<8x128xf32, #tpu.memory_space<vmem>>, vector<8x128xf32>
    tpu.vector_store %arg4[%c0_5, %c0_6], %6 {strides = array<i32>} : memref<8x128xf32, #tpu.memory_space<vmem>>, vector<8x128xf32>,
    return
  }
  func.func @transform_0(%arg0: i32) -> (i32, i32) {
    %c0_i32 = arith.constant 0 : i32
    %c0_i32_0 = arith.constant 0 : i32
    %c0_i32_1 = arith.constant 0 : i32
    return %c0_i32, %c0_i32_0 : i32, i32
  }
  func.func @transform_1(%arg0: i32) -> (i32, i32) {
    %c0_i32 = arith.constant 0 : i32
    %c0_i32_0 = arith.constant 0 : i32
    return %arg0, %c0_i32 : i32, i32
  }
  func.func @transform_2(%arg0: i32) -> (i32, i32) {
    %c0_i32 = arith.constant 0 : i32
    %c0_i32_0 = arith.constant 0 : i32
    return %c0_i32, %arg0 : i32, i32
  }
  func.func @transform_3(%arg0: i32) -> (i32, i32) {
    %c0_i32 = arith.constant 0 : i32
    %c0_i32_0 = arith.constant 0 : i32
    return %c0_i32, %arg0 : i32, i32
  }
}

</mosaic_0001>

<bundles_post_ra>
// kernel: tpu_custom_call.1
= control target key start
LH: loop header
LB: loop body
LE: loop exit
PB: predicated region body
PF: predicated region fallthrough
CT: control target
= control target key end

     0   :  { %8 = vsyncpa [#allocation3], 0  ;;  %s878_s0 = inlined_call_operand.hbm [shape: f32[8,256], index: 0, kind: input, shape index: {}]   ;;  %s879_s1 = inlined_call_operand.hbm [shape: f32[256,256], index: 1, kind: input, shape index: {}]   ;;  %s880_s2 = inlined_call_operand.vmem [shape: f32[1,256], index: 2, kind: input, shape index: {}]   ;;  %s881_s3 = inlined_call_operand.hbm [shape: f32[8,256], index: 3, kind: output, shape index: {}]  }
   0x1   :  { %9 = vsyncpa [#allocation6], 0 }
   0x2   :  { %11 = vsyncpa [#allocation6 + $0x1], 0 }
   0x3   :  { %12 = vsyncpa [#allocation4], 0 }
   0x4   :  { %14 = vsyncpa [#allocation4 + $0x1], 0  ;;  %s665_s12 = smov 0   ;;  %s667_s13 = smov 0  }
   0x5   :  { %s669_s14 = smov 0   ;;  %s671_s15 = smov 0  }
   0x6 LB: > { %s686_s16 = sadd.s32 4294967295, %s638_s15   ;;  %s436_s17 = sadd.s32 4294967294, %s638_s15   ;;  %s638_s15 = sphi %s671_s15, %s904_s15   ;;  %s634_s14 = sphi %s669_s14, %s903_s14   ;;  %s630_s13 = sphi %s667_s13, %s902_s13   ;;  %s626_s12 = sphi %s665_s12, %s901_s12  }
   0x7   : > { %s690_s18 = sadd.s32 1, %s638_s15   ;;  %s48_s19 = sadd.s32 1, %s634_s14 }
   0x8   : > { %s45_s20 = ssub.s32 %s638_s15, %s690_s18  ;;  %p55_p0 = scmp.ne.s32.totalorder %s634_s14, %s630_s13 }
   0x9   : > { %p46_p1 = scmp.eq.s32.totalorder %s45_s20, 0  ;;  %p56_p2 = scmp.eq.s32.totalorder %s638_s15, 0 }
   0xa   : > { %p61_p3 = scmp.ne.s32.totalorder %s630_s13, %s626_s12  ;;  %p882_p4 = scmp.eq.s32.totalorder %s686_s16, 0 }
   0xb   : > { %s702_s21 = scalar_select %p46_p1, %s634_s14, %s48_s19  }
   0xc   : > { %p704_p5 = por %p56_p2, %p55_p0  ;;  %p710_p6 = por %p882_p4, %p61_p3 }
   0xd   : > { %p111_p7 = scmp.eq.s32.totalorder %s686_s16, 1  ;;  %p117_p8 = scmp.eq.s32.totalorder %s436_s17, 1 }
   0xe   : > { %s887_s23 = scalar_select %p710_p6, 1, 0 }
   0xf   : > { %p437_p9 = scmp.ge.s32.totalorder %s638_s15, 1  ;;  %p124_p10 = scmp.lt.s32.totalorder %s638_s15, 3 }
  0x10   : > { %p717_p11 = por %p111_p7, %p55_p0  ;;  %p721_p12 = por %p117_p8, %p61_p3 }
  0x11   : > { %p725_p13 = pnand %p437_p9, %p124_p10  ;;  %s640_s27 = smov [#allocation2]  }
  0x12   : > { %s888_s24 = scalar_select %p717_p11, 1, 0 }
  0x13   : > { %s889_s25 = scalar_select %p721_p12, 1, 0 }
  0x14   : > { %s890_s26 = scalar_select %p725_p13, 1, 0 }
  0x15   : > { %p463_p2 = pneg %p725_p13  ;;  %s137_s28 = sshll.u32 %s640_s27, 4  ;;  %s138_s28 = int_to_ptr.vmem [resolvable:$true] %s137_s28 }
  0x16   : > { %p476_p4 = scmp.lt.s32.totalorder %s638_s15, 2  ;;  %p891_p0 = scmp.eq.s32.totalorder %s686_s16, 0 }
  0x17   : > { %s148_s30 = sand.u32 1, %s634_s14   ;;  %s527_s6 = scalar_lea.vmem %s138_s28, 256 }
  0x18   : > { %p735_p7 = pnand %p463_p2, %p891_p0  ;;  %p742_p3 = pnand %p476_p4, %p704_p5 }
  0x19   : > { %s440_s5 = sshll.u32 %s148_s30, 8  ;;  %p528_p9 = scmp.ne.s32.totalorder %s138_s28, %s527_s6 }
  0x1a   : > { %p518_p8 = pneg %p735_p7  ;;  %p535_p12 = scmp.lt.s32.totalorder %s138_s28, %s138_s28 }
  0x1b   : > { %p536_p11 = scmp.lt.s32.totalorder %s527_s6, %s527_s6 }
  0x1c   : > { %p530_p10 = pnand %p528_p9, %p518_p8 }
  0x1d   : > { %p537_p2 = por %p536_p11, %p535_p12 }
  0x1e   : > { %p531_p1 = pneg %p530_p10 }
  0x20   : > { %p538_p0 = pnand %p537_p2, %p531_p1 }
  0x22   : > { %541 = shalt.err (!%p538_p0)
}
  0x23   : > { %466 = dma.hbm_to_vmem [thread:$0]  (!%p735_p7), %s878_s0, 256, %s138_s28, [#allocation3]  }
  0x24   : > { %s454_s9 = sshll.u32 %s638_s15, 12  ;;  %s152_s10 = scalar_lea.vmem [#allocation5], %s440_s5 }
  0x25   : > { %s160_s11 = sshll.u32 %s152_s10, 4  ;;  %s757_s20 = scalar_lea.hbm %s879_s1, %s454_s9  ;;  %s759_s11 = int_to_ptr.vmem [resolvable:$true] %s160_s11 }
  0x26   : > { %s761_s22 = scalar_lea.sflag [#allocation6], %s148_s30  ;;  %s542_s27 = scalar_lea.hbm %s757_s20, 4096 }
  0x27   : > { %p543_p4 = scmp.ne.s32.totalorder %s757_s20, %s542_s27  ;;  %p544_p5 = pneg %p742_p3 }
  0x28   : > { %s547_s5 = scalar_lea.hbm %s879_s1, 8192  ;;  %p548_p1 = scmp.lt.s32.totalorder %s757_s20, %s879_s1 }
  0x29   : > { %p545_p11 = pnand %p544_p5, %p543_p4  ;;  %p549_p7 = scmp.lt.s32.totalorder %s547_s5, %s542_s27 }
  0x2b   : > { %p546_p12 = pneg %p545_p11  ;;  %p550_p8 = por %p549_p7, %p548_p1 }
  0x2d   : > { %p551_p9 = pnand %p550_p8, %p546_p12 }
  0x2f   : > { %554 = shalt.err (!%p551_p9)
}
  0x30   : > { %s555_s30 = scalar_lea.vmem %s759_s11, 4096  ;;  %s641_s8 = smov [#allocation5]  }
  0x31   : > { %p556_p10 = scmp.ne.s32.totalorder %s759_s11, %s555_s30  ;;  %s560_s9 = sshll.u32 %s641_s8, 4  ;;  %s561_s9 = int_to_ptr.vmem [resolvable:$false] %s560_s9 }
  0x32   : > { %s562_s10 = scalar_lea.vmem %s561_s9, 8192  ;;  %p563_p4 = scmp.lt.s32.totalorder %s759_s11, %s561_s9 }
  0x33   : > { %p558_p2 = pnand %p556_p10, %p544_p5  ;;  %p564_p11 = scmp.lt.s32.totalorder %s562_s10, %s555_s30 }
  0x35   : > { %p559_p0 = pneg %p558_p2  ;;  %p565_p6 = por %p564_p11, %p563_p4 }
  0x37   : > { %p566_p13 = pnand %p565_p6, %p559_p0 }
  0x39   : > { %569 = shalt.err (!%p566_p13)
}
  0x3a   : > { %s642_s17 = smov 256   ;;  %s643_s19 = smov 16  }
  0x3b   : > { %470 = dma.hbm_to_vmem [thread:$0]  (!%p742_p3), %s757_s20, 4096, %s759_s11, %s761_s22, %s642_s17, %s642_s17, %s643_s19  }
  0x3c   : > { %p894_p5 = scmp.ne.s32.totalorder %s890_s26, 0 }
  0x3d   : > { %p895_p12 = scmp.eq.s32.totalorder (!%p894_p5), %s686_s16, 0 }
  0x3e   : > { %178 = sbr.rel (%p894_p5) target bundleno = 359 (0x167), region = 32 }
  0x43   : > { %613 = dma.done.wait (%p895_p12), [#allocation3], 256   ;;  %p896_p1 = pmov %p895_p12 }
  0x44   : > { %s789_s27 = sand.u32 1, %s630_s13   ;;  %p897_p6 = scmp.ne.s32.totalorder %s887_s23, 0 }
  0x45   : > { %615 = vsyncadd (%p896_p1), [#allocation3], 4294967040  ;;  %s446_s28 = sshll.u32 %s789_s27, 8  ;;  %s185_s29 = scalar_lea.sflag [#allocation6], %s789_s27 }
  0x46   : > { %s793_s5 = scalar_lea.vmem [#allocation5], %s446_s28 }
  0x47   : > { %617 = dma.done.wait (%p897_p6), %s185_s29, 4096  }
  0x48   : > { %619 = vsyncadd (%p897_p6), %s185_s29, 4294963200  ;;  %v251_v0 = vld [vmem:[%s793_s5 + $0xf8] sm:$0xff]  ;;  %v250_v1 = vld [vmem:[%s793_s5 + $0xf0] sm:$0xff]  ;;  %p215_p13 = scmp.lt.s32.totalorder %s686_s16, 1  ;;  %s447_s20 = sshll.u32 %s789_s27, 3 }
  0x49   : > { %v249_v2 = vld [vmem:[%s793_s5 + $0xe8] sm:$0xff]  ;;  %259 = vmatprep.subr.mxu0 %v251_v0  ;;  %v248_v3 = vld [vmem:[%s793_s5 + $0xe0] sm:$0xff]  ;;  %v247_v4 = vld [vmem:[%s793_s5 + $0xd8] sm:$0xff]  ;;  %s450_s22 = sshll.u32 %s686_s16, 7  ;;  %s213_s6 = scalar_lea.vmem [#allocation7], %s447_s20 }
  0x4a   : > { %260 = vmatpush1.xpose.msra.mxu0 %v250_v1  ;;  %v246_v5 = vld [vmem:[%s793_s5 + $0xd0] sm:$0xff]  ;;  %v245_v6 = vld [vmem:[%s793_s5 + $0xc8] sm:$0xff]  ;;  %v219_v7 = vld [vmem:[#allocation2 + $0x8] sm:$0xff]  ;;  %s216_s23 = scalar_select %p215_p13, %s686_s16, 1 }
  0x4b   : > { %261 = vmatprep.subr.mxu0 %v249_v2  ;;  %v244_v8 = vld [vmem:[%s793_s5 + $0xc0] sm:$0xff]  ;;  %323 = vmatprep.mubr.f32.mxu0 %v219_v7  ;;  %v243_v9 = vld [vmem:[%s793_s5 + $0xb8] sm:$0xff]  ;;  %v242_v10 = vld [vmem:[%s793_s5 + $0xb0] sm:$0xff]  ;;  %s345_s7 = sshll.u32 %s213_s6, 4  ;;  %s841_s9 = scalar_lea.hbm %s881_s3, %s450_s22  ;;  %s346_s7 = int_to_ptr.vmem [resolvable:$true] %s345_s7 }
  0x4c   : > { %v241_v11 = vld [vmem:[%s793_s5 + $0xa8] sm:$0xff]  ;;  %v240_v12 = vld [vmem:[%s793_s5 + $0xa0] sm:$0xff]  ;;  %v239_v13 = vld [vmem:[%s793_s5 + $0x98] sm:$0xff]  ;;  %s217_s11 = scalar_lea.vmem %s880_s2, %s216_s23  ;;  %s332_s10 = scalar_lea.sflag [#allocation4], %s789_s27 }
  0x4d   : > { %v238_v14 = vld [vmem:[%s793_s5 + $0x90] sm:$0xff]  ;;  %v237_v15 = vld [vmem:[%s793_s5 + $0x88] sm:$0xff]  ;;  %v236_v16 = vld [vmem:[%s793_s5 + $0x80] sm:$0xff]  ;;  %s570_s17 = scalar_lea.vmem %s346_s7, 128  ;;  %p898_p7 = scmp.ne.s32.totalorder %s888_s24, 0 }
  0x4e   : > { %262 = vmatpush1.xpose.msra.mxu0 %v248_v3  ;;  %v235_v17 = vld [vmem:[%s793_s5 + $0x78] sm:$0xff]  ;;  %v234_v18 = vld [vmem:[%s793_s5 + $0x70] sm:$0xff]  ;;  %v233_v19 = vld [vmem:[%s793_s5 + $0x68] sm:$0xff]  ;;  %p571_p3 = scmp.ne.s32.totalorder %s346_s7, %s570_s17  ;;  %s644_s19 = smov [#allocation7]  }
  0x4f   : > { %263 = vmatprep.subr.mxu0 %v247_v4  ;;  %v232_v20 = vld [vmem:[%s793_s5 + $0x60] sm:$0xff]  ;;  %v231_v21 = vld [vmem:[%s793_s5 + $0x58] sm:$0xff]  ;;  %v230_v22 = vld [vmem:[%s793_s5 + $0x50] sm:$0xff]  ;;  %s574_s28 = sshll.u32 %s644_s19, 4  ;;  %s575_s28 = int_to_ptr.vmem [resolvable:$false] %s574_s28 }
  0x50   : > { %v229_v23 = vld [vmem:[%s793_s5 + $0x48] sm:$0xff]  ;;  %v228_v24 = vld [vmem:[%s793_s5 + $0x40] sm:$0xff]  ;;  %v227_v25 = vld [vmem:[%s793_s5 + $0x38] sm:$0xff]  ;;  %p572_p8 = pnand %p571_p3, %p898_p7  ;;  %s576_s16 = scalar_lea.vmem %s575_s28, 256 }
  0x51   : > { %v226_v26 = vld [vmem:[%s793_s5 + $0x30] sm:$0xff]  ;;  %v225_v27 = vld [vmem:[%s793_s5 + $0x28] sm:$0xff]  ;;  %v224_v28 = vld [vmem:[%s793_s5 + $0x20] sm:$0xff]  ;;  %p577_p10 = scmp.lt.s32.totalorder %s346_s7, %s575_s28  ;;  %p578_p2 = scmp.lt.s32.totalorder %s576_s16, %s570_s17 }
  0x52   : > { %264 = vmatpush1.xpose.msra.mxu0 %v246_v5  ;;  %v223_v29 = vld [vmem:[%s793_s5 + $0x18] sm:$0xff]  ;;  %v222_v30 = vld [vmem:[%s793_s5 + $0x10] sm:$0xff]  ;;  %v221_v31 = vld [vmem:[%s793_s5 + $0x8] sm:$0xff]  ;;  %p573_p9 = pneg %p572_p8 }
  0x53   : > { %265 = vmatprep.subr.mxu0 %v245_v6  ;;  %v220_v32 = vld [vmem:[%s793_s5] sm:$0xff]  ;;  %v218_v33 = vld [vmem:[#allocation2] sm:$0xff]  ;;  %p579_p0 = por %p578_p2, %p577_p10 }
  0x54   : > { %v448_v34 = vld [vmem:[%s217_s11] ss:$0 sm:$0xff] }
  0x55   : > { %p580_p4 = pnand %p579_p0, %p573_p9 }
  0x56   : > { %266 = vmatpush1.xpose.msra.mxu0 %v244_v8 }
  0x57   : > { %267 = vmatprep.subr.mxu0 %v243_v9 }
  0x5a   : > { %268 = vmatpush1.xpose.msra.mxu0 %v242_v10 }
  0x5b   : > { %269 = vmatprep.subr.mxu0 %v241_v11 }
  0x5e   : > { %270 = vmatpush1.xpose.msra.mxu0 %v240_v12 }
  0x5f   : > { %271 = vmatprep.subr.mxu0 %v239_v13 }
  0x62   : > { %272 = vmatpush1.xpose.msra.mxu0 %v238_v14 }
  0x63   : > { %273 = vmatprep.subr.mxu0 %v237_v15 }
  0x66   : > { %274 = vmatpush1.xpose.msra.mxu0 %v236_v16 }
  0x67   : > { %275 = vmatprep.subr.mxu0 %v235_v17 }
  0x6a   : > { %276 = vmatpush1.xpose.msra.mxu0 %v234_v18 }
  0x6b   : > { %277 = vmatprep.subr.mxu0 %v233_v19 }
  0x6e   : > { %278 = vmatpush1.xpose.msra.mxu0 %v232_v20 }
  0x6f   : > { %279 = vmatprep.subr.mxu0 %v231_v21 }
  0x72   : > { %280 = vmatpush1.xpose.msra.mxu0 %v230_v22 }
  0x73   : > { %281 = vmatprep.subr.mxu0 %v229_v23 }
  0x76   : > { %282 = vmatpush1.xpose.msra.mxu0 %v228_v24 }
  0x77   : > { %283 = vmatprep.subr.mxu0 %v227_v25 }
  0x7a   : > { %284 = vmatpush1.xpose.msra.mxu0 %v226_v26 }
  0x7b   : > { %285 = vmatprep.subr.mxu0 %v225_v27 }
  0x7e   : > { %286 = vmatpush1.xpose.msra.mxu0 %v224_v28 }
  0x7f   : > { %287 = vmatprep.subr.mxu0 %v223_v29 }
  0x82   : > { %288 = vmatpush1.xpose.msra.mxu0 %v222_v30 }
  0x83   : > { %289 = vmatprep.subr.mxu0 %v221_v31 }
  0x86   : > { %290 = vmatpush1.xpose.msra.mxu0 %v220_v32 }
  0x89   : > { %324 = vmatmul.mubr.f32.vlgmr.msra.gmra.mxu0 %v218_v33 }
 0x149   : > { %v325_v35 = vpop.f32.mrf.mxu0 }
 0x14a   : > { %v326_v36 = vadd.f32 %v448_v34, %v325_v35 }
 0x14b   : > { %v327_v37 = vpop.f32.mrf.mxu0 }
 0x14c   : > { %514 = vtanh.f32 %v326_v36 }
 0x159   : > { %v515_v38 = vpop.eup %514 }
 0x15a   : > { %330 = vst [vmem:[%s213_s6] sm:$0xff] %v515_v38 }
 0x15b   : > { %583 = shalt.err (!%p580_p4)
}
 0x15c   : > { %s584_s29 = scalar_lea.hbm %s841_s9, 128  ;;  %s588_s23 = scalar_lea.hbm %s881_s3, 256 }
 0x15d   : > { %p585_p11 = scmp.ne.s32.totalorder %s841_s9, %s584_s29  ;;  %p589_p1 = scmp.lt.s32.totalorder %s841_s9, %s881_s3 }
 0x15e   : > { %p590_p6 = scmp.lt.s32.totalorder %s588_s23, %s584_s29 }
 0x15f   : > { %p586_p5 = pnand %p585_p11, %p898_p7 }
 0x160   : > { %p591_p13 = por %p590_p6, %p589_p1 }
 0x161   : > { %p587_p12 = pneg %p586_p5 }
 0x163   : > { %p592_p3 = pnand %p591_p13, %p587_p12 }
 0x165   : > { %595 = shalt.err (!%p592_p3)
}
 0x166   : > { %461 = dma.vmem_to_hbm [thread:$0]  (%p898_p7), %s346_s7, 128, %s841_s9, %s332_s10  }
 0x167 PF: > { %s357_s11 = sand.u32 1, %s626_s12   ;;  %p899_p8 = scmp.ne.s32.totalorder %s889_s25, 0 }
 0x168   : > { %p900_p9 = scmp.ge.s32.totalorder %s638_s15, 2  ;;  %s358_s20 = scalar_lea.sflag [#allocation4], %s357_s11 }
 0x16a   : > { %p472_p10 = pnand %p900_p9, %p899_p8 }
 0x16c   : > { %p473_p2 = pneg %p472_p10 }
 0x16e   : > { %621 = dma.done.wait (%p473_p2), %s358_s20, 128  }
 0x16f   : > { %623 = vsyncadd (%p473_p2), %s358_s20, 4294967168  ;;  %p17_p0 = scmp.ge.s32.totalorder %s690_s18, 4   ;;  %s901_s12 = smov %s630_s13 }
 0x170   : > { %s902_s13 = smov %s634_s14  ;;  %s903_s14 = smov %s702_s21 }
 0x171   : > { %s904_s15 = smov %s690_s18  ;;  %19 = sbr.rel (!%p17_p0) target bundleno = 6 (0x6), region = 85 }
 0x176   :  { %363 = vsyncpa [#allocation3], 1 }
 0x177   :  { %365 = vsyncpa [#allocation3 + $0x1], 1 }
 0x178   :  { %366 = vsyncpa [#allocation6], 1 }
 0x179   :  { %368 = vsyncpa [#allocation6 + $0x1], 1 }
 0x17a   :  { %369 = vsyncpa [#allocation4], 1 }
 0x17b   :  { %371 = vsyncpa [#allocation4 + $0x1], 1 }

</bundles_post_ra>
